<compile_context>
chip_gen: v5e
topology: v5e:2x2
jax: 0.10.0
libtpu: 0.0.40
codegen_flags: <defaults>
</compile_context>

<pallas_src>
import functools

import jax
import jax.numpy as jnp
from jax.experimental import pallas as pl
from jax.experimental.pallas import tpu as pltpu


def _round_up(x, m):
    return (x + m - 1) // m * m


def _vmem_capacity_bytes():
    """Per-TensorCore VMEM; conservative 64 MiB (v7x) fallback."""
    try:
        cap = getattr(pltpu.get_tpu_info(), "vmem_capacity_bytes", None)
        if cap:
            return int(cap)
    except Exception:
        pass
    try:
        kind = jax.devices()[0].device_kind.lower()
        if "v5" in kind or "v6" in kind:
            return 128 * 1024 * 1024
    except Exception:
        pass
    return 64 * 1024 * 1024


def _pick_tile_n(n, c, itemsize, target_block_bytes=4 << 20):
    """Rows per tile: ~target_block_bytes per input block, even grid split."""
    c_pad = _round_up(c, 128)
    tile = max(8, (target_block_bytes // (c_pad * itemsize)) // 8 * 8)
    if tile >= n:
        return n                     # single block covering the full batch dim
    num = -(-n // tile)
    if num % 2:                      # even #tiles -> even v7x megacore split
        num += 1
    tile = max(8, _round_up(-(-n // num), 8))
    return n if tile >= n else tile


def _ce_partial_kernel(logp_ref, tgt_ref, out_ref, *, n_rows, tile_n, shift,
                       num_classes, normalize, needs_mask):
    """One row tile -> scalar partial sum of shifted_targets * logprobs,
    broadcast into a lane-dense (1, 8, 128) output block."""
    # Product in the input dtype (bf16 VALU on v6e/v7x), row-accumulate in f32.
    prod = (tgt_ref[...] * logp_ref[...]).astype(jnp.float32)
    row_tl = jnp.sum(prod, axis=1, keepdims=True)                # (tile_n, 1)

    if normalize:
        # 'Const' smoothing folded into row reductions (never materialize
        # `shifted`, no per-element normalize multiply):
        #   sum_c(shifted*lp) = (sum_c(t*lp) + s*sum_c(lp)) / (sum_c(t) + C*s)
        row_lp = jnp.sum(logp_ref[...].astype(jnp.float32), axis=1, keepdims=True)
        row_t = jnp.sum(tgt_ref[...].astype(jnp.float32), axis=1, keepdims=True)
        num = row_tl + jnp.float32(shift) * row_lp
        den = row_t + jnp.float32(num_classes * shift)
        inv = pl.reciprocal(den, approx=True)        # EUP (free slot)
        inv = inv * (jnp.float32(2.0) - den * inv)   # one Newton step -> ~f32
        contrib = num * inv
    else:
        contrib = row_tl

    if needs_mask:
        # Ragged last tile: rows past n_rows hold unspecified data -> zero them.
        rows = jax.lax.broadcasted_iota(jnp.int32, contrib.shape, 0)
        valid = (pl.program_id(0) * tile_n + rows) < n_rows
        contrib = jnp.where(valid, contrib, jnp.float32(0.0))

    partial = jnp.sum(contrib)
    out_ref[...] = jnp.broadcast_to(partial, out_ref.shape).astype(out_ref.dtype)


def cross_entropy_loss(logprobs, targets, *, label_smoothing_mode="None",
                       label_smoothing_rate=0.0, seed=0, tile_n=None):
    """Pallas TPU implementation of CrossEntropyLoss.forward.

    logprobs, targets: (N, C) float arrays (f32 or bf16; bf16 halves HBM
    traffic, product is done in bf16 and accumulated in f32).
    """
    N, C = logprobs.shape
    assert targets.shape == (N, C)
    orig_n = N

    if label_smoothing_mode == "None":
        shift = 0.0
    else:
        assert 0.0 <= label_smoothing_rate < 0.5, "shift diverges at rate=0.5"
        shift = float(label_smoothing_rate / (1.0 - 2.0 * label_smoothing_rate))

    normalize = False
    if shift > 0.0:
        if label_smoothing_mode == "Const":
            normalize = True          # algebraic in-kernel rewrite
        elif label_smoothing_mode == "Random":
            # TODO(synk): noise comes from jax.random in the wrapper (the
            # in-kernel TPU stateful PRNG has no interpret/CPU lowering and
            # cannot bit-match torch.randn_like anyway).
            noise = jnp.abs(jax.random.normal(jax.random.PRNGKey(seed),
                                              (N, C), jnp.float32)
                            * jnp.float32(shift))
            shifted = targets.astype(jnp.float32) + noise
            targets = shifted / jnp.sum(shifted, axis=1, keepdims=True)
            shift = 0.0               # already applied + normalized
        else:
            raise ValueError(f"unknown label_smoothing_mode: {label_smoothing_mode}")

    # Narrow class dims on the plain-sum path: fold rows into the lane dim with
    # a free row-major reshape for lane-dense DMAs / full vreg utilization.
    if not normalize and C < 128:
        for k in (128, 64, 32, 16, 8, 4, 2):
            if N % k == 0:
                logprobs = logprobs.reshape(N // k, k * C)
                targets = targets.reshape(N // k, k * C)
                N, C = N // k, k * C
                break

    itemsize = max(jnp.dtype(logprobs.dtype).itemsize,
                   jnp.dtype(targets.dtype).itemsize)
    if tile_n is None:
        tile_n = _pick_tile_n(N, C, itemsize)
    tile_n = int(tile_n)
    assert tile_n > 0 and (tile_n == N or tile_n % 8 == 0)

    num_tiles = -(-N // tile_n)
    needs_mask = (N % tile_n) != 0

    kernel = functools.partial(
        _ce_partial_kernel, n_rows=N, tile_n=tile_n, shift=shift,
        num_classes=C, normalize=normalize, needs_mask=needs_mask)

    # VMEM budget: 2 inputs x 2 pipeline buffers + in-kernel f32 temporaries
    # (product, casts) + lane-dense output block + headroom for Mosaic scratch.
    c_pad = _round_up(C, 128)
    blk_elems = tile_n * c_pad
    in_vmem = 2 * 2 * blk_elems * itemsize
    f32_temps = (3 if normalize else 1) * blk_elems * 4
    out_vmem = 2 * 8 * 128 * 4
    vmem_cap = _vmem_capacity_bytes()
    vmem_limit = max(32 << 20,
                     min(int(0.9 * vmem_cap),
                         in_vmem + f32_temps + out_vmem + (8 << 20)))

    partials = pl.pallas_call(
        kernel,
        out_shape=jax.ShapeDtypeStruct((num_tiles, 8, 128), jnp.float32),
        grid_spec=pltpu.PrefetchScalarGridSpec(
            num_scalar_prefetch=0,
            grid=(num_tiles,),
            in_specs=[
                pl.BlockSpec((tile_n, C), lambda i: (i, 0)),
                pl.BlockSpec((tile_n, C), lambda i: (i, 0)),
            ],
            out_specs=pl.BlockSpec((1, 8, 128), lambda i: (i, 0, 0)),
        ),
        compiler_params=pltpu.CompilerParams(
            dimension_semantics=("parallel",),   # independent tiles -> megacore OK
            vmem_limit_bytes=int(vmem_limit),
        ),
        cost_estimate=pl.CostEstimate(
            flops=(8 if normalize else 3) * N * C,
            transcendentals=0,
            bytes_accessed=2 * N * C * itemsize + num_tiles * 8 * 128 * 4,
        ),
    )(logprobs, targets)

    return -jnp.sum(partials[:, 0, 0]) / jnp.float32(orig_n)


def _reference_loss(logprobs, targets, mode, rate, seed=0):
    """Pure-JAX reference (all modes) for verification."""
    if mode == "None" or rate == 0.0:
        shifted = targets
    else:
        shift = rate / (1.0 - 2.0 * rate)
        if mode == "Const":
            shifted = targets + shift
        else:  # Random — identical wrapper-side noise
            noise = jnp.abs(jax.random.normal(jax.random.PRNGKey(seed),
                                              targets.shape, jnp.float32) * shift)
            shifted = targets + noise
        shifted = shifted / jnp.sum(shifted, axis=1, keepdims=True)
    return -jnp.sum(shifted * logprobs) / logprobs.shape[0]


if __name__ == "__main__":
    key = jax.random.PRNGKey(0)
    k1, k2, k3, k4, k5, k6 = jax.random.split(key, 6)

    # case 1: small aligned shapes (batch=16, classes=32); lane folding on "None"
    N, C = 16, 32
    lp = jax.nn.log_softmax(jax.random.normal(k1, (N, C), jnp.float32), axis=1)
    tg = jax.nn.softmax(jax.random.normal(k2, (N, C), jnp.float32), axis=1)

    out = jax.block_until_ready(cross_entropy_loss(lp, tg, label_smoothing_mode="None"))
    ref = _reference_loss(lp, tg, "None", 0.0)
    assert jnp.allclose(out, ref, rtol=1e-5, atol=1e-5), (out, ref)

    out = jax.block_until_ready(cross_entropy_loss(
        lp, tg, label_smoothing_mode="Const", label_smoothing_rate=0.1))
    ref = _reference_loss(lp, tg, "Const", 0.1)
    assert jnp.allclose(out, ref, rtol=1e-5, atol=1e-5), (out, ref)

    # case 2: ragged shapes (batch=20, classes=33) -> single full-dim block
    N2, C2 = 20, 33
    lp2 = jax.nn.log_softmax(jax.random.normal(k3, (N2, C2), jnp.float32), axis=1)
    tg2 = jax.nn.softmax(jax.random.normal(k4, (N2, C2), jnp.float32), axis=1)
    out2 = jax.block_until_ready(cross_entropy_loss(
        lp2, tg2, label_smoothing_mode="Const", label_smoothing_rate=0.2))
    ref2 = _reference_loss(lp2, tg2, "Const", 0.2)
    assert jnp.allclose(out2, ref2, rtol=1e-5, atol=1e-5), (out2, ref2)

    # case 3: multi-tile grid with a ragged last tile (in-kernel row mask)
    N3, C3 = 72, 160
    lp3 = jax.nn.log_softmax(jax.random.normal(k5, (N3, C3), jnp.float32), axis=1)
    tg3 = jax.nn.softmax(jax.random.normal(k6, (N3, C3), jnp.float32), axis=1)
    out3 = jax.block_until_ready(cross_entropy_loss(
        lp3, tg3, label_smoothing_mode="Const", label_smoothing_rate=0.1, tile_n=32))
    ref3 = _reference_loss(lp3, tg3, "Const", 0.1)
    assert jnp.allclose(out3, ref3, rtol=1e-5, atol=1e-5), (out3, ref3)

    out3n = jax.block_until_ready(cross_entropy_loss(
        lp3, tg3, label_smoothing_mode="None", tile_n=32))
    ref3n = _reference_loss(lp3, tg3, "None", 0.0)
    assert jnp.allclose(out3n, ref3n, rtol=1e-5, atol=1e-5), (out3n, ref3n)

    # case 4: 'Random' smoothing (wrapper-side jax.random noise, exact reference)
    outr = jax.block_until_ready(cross_entropy_loss(
        lp, tg, label_smoothing_mode="Random", label_smoothing_rate=0.1, seed=123))
    refr = _reference_loss(lp, tg, "Random", 0.1, seed=123)
    assert jnp.allclose(outr, refr, rtol=1e-5, atol=1e-5), (outr, refr)

    print("KERNEL_OK")
</pallas_src>

<mosaic_0001>
module attributes {stable_mosaic.version = 11 : i64} {
  func.func @_ce_partial_kernel(%arg0: i32, %arg1: memref<1x512xf32, #tpu.memory_space<vmem>>, %arg2: memref<1x512xf32, #tpu.memory_space<vmem>>, %arg3: memref<1x8x128xf32, #tpu.memory_space<vmem>>) attributes {dimension_semantics = [#tpu.dimension_semantics<parallel>], iteration_bounds = array<i64: 1>, scalar_prefetch = 0 : i64, scratch_operands = 0 : i64, tpu.core_type = #tpu.core_type<tc>, window_params = [{transform_indices = @transform_0, window_bounds = array<i64: 1, 512>}, {transform_indices = @transform_1, window_bounds = array<i64: 1, 512>}, {transform_indices = @transform_2, window_bounds = array<i64: 1, 8, 128>}]} {
    %c0 = arith.constant 0 : index
    %c0_0 = arith.constant 0 : index
    %0 = vector.load %arg2[%c0, %c0_0] : memref<1x512xf32, #tpu.memory_space<vmem>>, vector<1x512xf32>
    %c0_1 = arith.constant 0 : index
    %c0_2 = arith.constant 0 : index
    %1 = vector.load %arg1[%c0_1, %c0_2] : memref<1x512xf32, #tpu.memory_space<vmem>>, vector<1x512xf32>
    %2 = arith.mulf %0, %1 : vector<1x512xf32>
    %cst = arith.constant dense<0.000000e+00> : vector<1xf32>
    %3 = vector.multi_reduction <add>, %2, %cst [1] : vector<1x512xf32> to vector<1xf32>
    %4 = vector.shape_cast %3 : vector<1xf32> to vector<1x1xf32>
    %5 = vector.shape_cast %4 : vector<1x1xf32> to vector<1x1x1xf32>
    %cst_3 = arith.constant dense<0.000000e+00> : vector<1xf32>
    %6 = vector.multi_reduction <add>, %5, %cst_3 [1, 2] : vector<1x1x1xf32> to vector<1xf32>
    %7 = vector.shape_cast %6 : vector<1xf32> to vector<1x1x1xf32>
    %8 = vector.extract %7[0, 0, 0] : f32 from vector<1x1x1xf32>
    %9 = vector.broadcast %8 : f32 to vector<1x8x128xf32>
    %c0_4 = arith.constant 0 : index
    %c0_5 = arith.constant 0 : index
    %c0_6 = arith.constant 0 : index
    %10 = vector.load %arg3[%c0_4, %c0_5, %c0_6] : memref<1x8x128xf32, #tpu.memory_space<vmem>>, vector<1x8x128xf32>
    tpu.vector_store %arg3[%c0_4, %c0_5, %c0_6], %9 {strides = array<i32>} : memref<1x8x128xf32, #tpu.memory_space<vmem>>, vector<1x8x128xf32>,
    return
  }
  func.func @transform_0(%arg0: i32) -> (i32, i32) {
    %c0_i32 = arith.constant 0 : i32
    %c0_i32_0 = arith.constant 0 : i32
    return %arg0, %c0_i32 : i32, i32
  }
  func.func @transform_1(%arg0: i32) -> (i32, i32) {
    %c0_i32 = arith.constant 0 : i32
    %c0_i32_0 = arith.constant 0 : i32
    return %arg0, %c0_i32 : i32, i32
  }
  func.func @transform_2(%arg0: i32) -> (i32, i32, i32) {
    %c0_i32 = arith.constant 0 : i32
    %c0_i32_0 = arith.constant 0 : i32
    %c0_i32_1 = arith.constant 0 : i32
    return %arg0, %c0_i32, %c0_i32_0 : i32, i32, i32
  }
}

</mosaic_0001>

<bundles_post_ra>
// kernel: tpu_custom_call.1
= control target key start
LH: loop header
LB: loop body
LE: loop exit
PB: predicated region body
PF: predicated region fallthrough
CT: control target
= control target key end

     0   :  { %7 = vsyncpa [#allocation3], 0  ;;  %s194_s0 = inlined_call_operand.hbm [shape: f32[1,512], index: 0, kind: input, shape index: {}]   ;;  %s195_s1 = inlined_call_operand.hbm [shape: f32[1,512], index: 1, kind: input, shape index: {}]   ;;  %s196_s2 = inlined_call_operand.hbm [shape: f32[1,8,128], index: 2, kind: output, shape index: {}]  }
   0x1   :  { %8 = vsyncpa [#allocation6], 0 }
   0x2   :  { %9 = vsyncpa [#allocation4], 0  ;;  %s15_s11 = sshll.u32 %s194_s0, 4  ;;  %s167_s12 = smov [#allocation2]   ;;  %s16_s11 = int_to_ptr.hbm [resolvable:$true] %s15_s11 }
   0x3   :  { %s17_s13 = sshll.u32 %s167_s12, 4  ;;  %s26_s16 = sshll.u32 %s195_s1, 4  ;;  %s18_s13 = int_to_ptr.vmem [resolvable:$true] %s17_s13  ;;  %s27_s16 = int_to_ptr.hbm [resolvable:$true] %s26_s16 }
   0x4   :  { %20 = dma.hbm_to_vmem [thread:$0]  %s16_s11, 64, %s18_s13, [#allocation3]  }
   0x5   :  { %s168_s17 = smov [#allocation5]  }
   0x6   :  { %s28_s18 = sshll.u32 %s168_s17, 4  ;;  %s29_s18 = int_to_ptr.vmem [resolvable:$true] %s28_s18 }
   0x7   :  { %31 = dma.hbm_to_vmem [thread:$0]  %s27_s16, 64, %s29_s18, [#allocation6]  }
   0x8   :  { %161 = dma.done.wait [#allocation3], 64  }
   0x9   :  { %162 = vsyncadd [#allocation3], 4294967232 }
   0xa   :  { %163 = dma.done.wait [#allocation6], 64  }
   0xb   :  { %164 = vsyncadd [#allocation6], 4294967232  ;;  %v40_v0 = vld [vmem:[#allocation5] sm:$0xf]  ;;  %v41_v1 = vld [vmem:[#allocation2] sm:$0xf] }
   0xc   :  { %v42_v2 = vmul.f32 %v41_v1, %v40_v0  ;;  %vm52_vm0 = vcmask 1040384   ;;  %s169_s0 = smov [#allocation7]   ;;  %s73_s21 = sshll.u32 %s196_s2, 4  ;;  %s74_s21 = int_to_ptr.hbm [resolvable:$true] %s73_s21 }
   0xd   :  { %s71_s1 = sshll.u32 %s169_s0, 4  ;;  %s72_s1 = int_to_ptr.vmem [resolvable:$true] %s71_s1 }
   0xe   :  { %v44_v3 = vperm.slane %v42_v2, 0  ;;  %v45_v4 = vperm.slane %v42_v2, 1  ;;  %v46_v5 = vperm.slane %v42_v2, 2  ;;  %v47_v6 = vperm.slane %v42_v2, 3 }
  0x10   :  { %v53_v7 = vsel %vm52_vm0, %v44_v3, 0.0  ;;  %v54_v8 = vsel %vm52_vm0, %v45_v4, 0.0  ;;  %v56_v9 = vsel %vm52_vm0, %v46_v5, 0.0  ;;  %v58_v11 = vsel %vm52_vm0, %v47_v6, 0.0 }
  0x11   :  { %v55_v10 = vadd.f32 %v54_v8, %v53_v7 }
  0x13   :  { %v57_v12 = vadd.f32 %v56_v9, %v55_v10 }
  0x15   :  { %v59_v13 = vadd.f32 %v58_v11, %v57_v12 }
  0x17   :  { %60 = vadd.xlane.f32.xlu0 %v59_v13 }
  0x8a   :  { %v61_v14 = vpop.xlane.xlu0 %60 }
  0x8b   :  { %84 = vpush %v61_v14 }
  0xbc   :  { %s85_s22 = spop %84 }
  0xbd   :  { %v64_v15 = vstv %s85_s22 }
  0xbe   :  { %65 = vst [vmem:[#allocation7] sm:$0xff] %v64_v15 }
  0xbf   :  { %76 = dma.vmem_to_hbm [thread:$0]  %s72_s1, 128, %s74_s21, [#allocation4]  }
  0xc0   :  { %165 = dma.done.wait [#allocation4], 128  }
  0xc1   :  { %166 = vsyncadd [#allocation4], 4294967168 }
  0xc2   :  { %81 = vsyncpa [#allocation3], 1 }
  0xc3   :  { %82 = vsyncpa [#allocation6], 1 }
  0xc4   :  { %83 = vsyncpa [#allocation4], 1 }

</bundles_post_ra>
